<compile_context>
chip_gen: v7x
topology: tpu7x:2x2x1
jax: 0.10.0
libtpu: 0.0.40
codegen_flags: <defaults>
</compile_context>

<pallas_src>
import functools

import jax
import jax.numpy as jnp
from jax import lax
from jax.experimental import pallas as pl
from jax.experimental.pallas import tpu as pltpu

LEAKY_SLOPE = 0.2
BN_EPS = 0.8          # nn.BatchNorm2d(out_ch, 0.8): 2nd positional arg is eps


def _round_up(a, m):
    return -(-a // m) * m


def _cdiv(a, b):
    return -(-a // b)


# ---------------------------------------------------------------------------
# Kernels: cols blocks are (K, tile) (K on sublanes, spatial on lanes),
# weights are (Cout, K); every kernel emits lane-dense (Cout, tile) tiles.
# ---------------------------------------------------------------------------
def _conv_stats_kernel(cols_ref, w_ref, conv_ref, stats_ref):
    """Pass 1 (bn, materialize): bf16 conv tile + per-tile BN partial stats."""
    conv = lax.dot_general(
        w_ref[...], cols_ref[...],                    # (Cout,K) @ (K,tile)
        dimension_numbers=(((1,), (0,)), ((), ())),
        preferred_element_type=jnp.float32)           # (Cout, tile) f32
    conv_ref[...] = conv.astype(conv_ref.dtype)
    stats_ref[:, 0:1] = jnp.sum(conv, axis=1, keepdims=True)
    stats_ref[:, 1:2] = jnp.sum(conv * conv, axis=1, keepdims=True)


def _stats_only_kernel(cols_ref, w_ref, stats_ref):
    """Pass 1 (bn, recompute): partial stats only, conv not materialized."""
    conv = lax.dot_general(
        w_ref[...], cols_ref[...],
        dimension_numbers=(((1,), (0,)), ((), ())),
        preferred_element_type=jnp.float32)
    stats_ref[:, 0:1] = jnp.sum(conv, axis=1, keepdims=True)
    stats_ref[:, 1:2] = jnp.sum(conv * conv, axis=1, keepdims=True)


def _bn_leaky_kernel(conv_ref, scale_ref, shift_ref, out_ref):
    """Pass 2 (bn, materialize): folded per-channel affine + LeakyReLU."""
    y = conv_ref[...].astype(jnp.float32) * scale_ref[...] + shift_ref[...]
    out_ref[...] = jnp.where(y > 0, y, LEAKY_SLOPE * y).astype(out_ref.dtype)


def _conv_bn_leaky_kernel(cols_ref, w_ref, scale_ref, shift_ref, out_ref):
    """Pass 2 (bn, recompute): redo the matmul, fuse affine + LeakyReLU."""
    conv = lax.dot_general(
        w_ref[...], cols_ref[...],
        dimension_numbers=(((1,), (0,)), ((), ())),
        preferred_element_type=jnp.float32)
    y = conv * scale_ref[...] + shift_ref[...]
    out_ref[...] = jnp.where(y > 0, y, LEAKY_SLOPE * y).astype(out_ref.dtype)


def _conv_bias_leaky_kernel(cols_ref, w_ref, b_ref, out_ref):
    """bn=False path: conv + bias + LeakyReLU in a single pass."""
    conv = lax.dot_general(
        w_ref[...], cols_ref[...],
        dimension_numbers=(((1,), (0,)), ((), ())),
        preferred_element_type=jnp.float32)
    y = conv + b_ref[...]
    out_ref[...] = jnp.where(y > 0, y, LEAKY_SLOPE * y).astype(out_ref.dtype)


# ---------------------------------------------------------------------------
# Wrapper helpers
# ---------------------------------------------------------------------------
def _patches_per_image(x):
    """(N,Cin,H,W) -> (N, Cin*9, Ho*Wo); K ordered (cin, kh, kw)."""
    N, Cin, H, W = x.shape
    Ho, Wo = (H - 1) // 2 + 1, (W - 1) // 2 + 1
    xp = jnp.pad(x, ((0, 0), (0, 0), (1, 1), (1, 1)))
    taps = [lax.slice(xp, (0, 0, kh, kw),
                      (N, Cin, kh + 2 * Ho - 1, kw + 2 * Wo - 1),
                      (1, 1, 2, 2))                    # (N, Cin, Ho, Wo)
            for kh in range(3) for kw in range(3)]
    cols = jnp.stack(taps, axis=2)                     # (N, Cin, 9, Ho, Wo)
    return cols.reshape(N, Cin * 9, Ho * Wo), Ho, Wo


def _patches_batch_folded(x):
    """(N,Cin,H,W) -> (Cin*9, N*Ho*Wo); batch folded into the lane axis."""
    N, Cin, H, W = x.shape
    Ho, Wo = (H - 1) // 2 + 1, (W - 1) // 2 + 1
    xt = jnp.transpose(x, (1, 0, 2, 3))                # small at deep layers
    xp = jnp.pad(xt, ((0, 0), (0, 0), (1, 1), (1, 1)))
    taps = [lax.slice(xp, (0, 0, kh, kw),
                      (Cin, N, kh + 2 * Ho - 1, kw + 2 * Wo - 1),
                      (1, 1, 2, 2))                    # (Cin, N, Ho, Wo)
            for kh in range(3) for kw in range(3)]
    cols = jnp.stack(taps, axis=1)                     # (Cin, 9, N, Ho, Wo)
    return cols.reshape(Cin * 9, N * Ho * Wo), Ho, Wo


def _vmem_budget():
    """(tile-sizing budget, vmem_limit_bytes) picked per TPU generation."""
    kind = ""
    try:
        kind = jax.devices()[0].device_kind.lower()
    except Exception:
        pass
    mib = 1024 * 1024
    if "v7" in kind:                                   # 64 MiB VMEM per TC
        return 44 * mib, 56 * mib
    if any(v in kind for v in ("v4", "v5", "v6")):     # 128 MiB VMEM
        return 80 * mib, 100 * mib
    return 40 * mib, 48 * mib


def _pick_tile(S, K, Cout, per_lane_bytes, budget, override=None):
    """Largest 128-aligned lane tile keeping double-buffered blocks in VMEM."""
    fixed = 4 * Cout * K + (1 << 20)     # double-buffered bf16 weights + slack
    avail = max(budget - fixed, 2 << 20)
    max_tile = max(128, min(8192, (avail // per_lane_bytes) // 128 * 128))
    if override is not None:
        max_tile = max(128, (int(override) // 128) * 128)
    if S <= max_tile:
        tile = _round_up(S, 128) if S >= 128 else _round_up(S, 8)
        return tile, 1
    tile = _round_up(_cdiv(S, _cdiv(S, max_tile)), 128)
    return tile, _cdiv(S, tile)


# ---------------------------------------------------------------------------
# Wrapper
# ---------------------------------------------------------------------------
@functools.partial(jax.jit, static_argnames=("bn", "max_tile_override"))
def encoder_block(x, w, b, gamma, beta, *, bn=True, max_tile_override=None):
    """x: (N, Cin, H, W) f32; w: (Cout, Cin, 3, 3). Returns (N, Cout, Ho, Wo) f32."""
    N, Cin, H, W = x.shape
    Cout = w.shape[0]
    K = Cin * 9
    Ho, Wo = (H - 1) // 2 + 1, (W - 1) // 2 + 1
    HW = Ho * Wo

    # Deep-layer batch folding: when per-image spatial is small, merge the
    # batch into the lane axis so tiles stay lane-dense.
    fold_batch = (HW < 256) and (N > 1)

    xb = x.astype(jnp.bfloat16)
    if fold_batch:
        cols, _, _ = _patches_batch_folded(xb)         # (K, N*HW)
        cols = cols[None]                              # (1, K, N*HW)
    else:
        cols, _, _ = _patches_per_image(xb)            # (N, K, HW)
    NB = cols.shape[0]
    S = cols.shape[-1]

    # Weight -> (Cout, K); reshape of (Cout, Cin, 3, 3) already matches the
    # (cin, kh, kw) K ordering of the patches.
    w_mat = w.reshape(Cout, K).astype(jnp.bfloat16)

    # bn path: skip materializing the conv intermediate when re-reading cols
    # in pass 2 is cheaper than a bf16 conv_buf HBM round trip.
    recompute = bool(bn) and (K < 2 * Cout)
    if bn:
        per_lane = (4 * K + 8 * Cout) if recompute else max(4 * K + 4 * Cout, 12 * Cout)
    else:
        per_lane = 4 * K + 8 * Cout

    budget, vmem_limit = _vmem_budget()
    tile, T = _pick_tile(S, K, Cout, per_lane, budget, max_tile_override)
    Sp = tile * T
    if Sp != S:
        # Zero-padded columns give conv == 0 (no bias in the bn pass), so the
        # BN statistics (divided by the true count) stay exact; padded outputs
        # are sliced off below.
        cols = jnp.pad(cols, ((0, 0), (0, 0), (0, Sp - S)))

    cparams = pltpu.CompilerParams(
        dimension_semantics=("parallel", "parallel"),
        vmem_limit_bytes=vmem_limit)

    cols_spec = pl.BlockSpec((None, K, tile), lambda n, t: (n, 0, t))
    w_spec = pl.BlockSpec((Cout, K), lambda n, t: (0, 0))
    chan_spec = pl.BlockSpec((Cout, 1), lambda n, t: (0, 0))
    map_spec = pl.BlockSpec((None, Cout, tile), lambda n, t: (n, 0, t))
    stat_spec = pl.BlockSpec((None, Cout, 2), lambda n, t: (n * T + t, 0, 0))

    if bn:
        if recompute:
            stats = pl.pallas_call(
                _stats_only_kernel,
                out_shape=jax.ShapeDtypeStruct((NB * T, Cout, 2), jnp.float32),
                grid=(NB, T),
                in_specs=[cols_spec, w_spec],
                out_specs=stat_spec,
                compiler_params=cparams,
            )(cols, w_mat)
            conv_buf = None
        else:
            conv_buf, stats = pl.pallas_call(
                _conv_stats_kernel,
                out_shape=(
                    jax.ShapeDtypeStruct((NB, Cout, Sp), jnp.bfloat16),
                    jax.ShapeDtypeStruct((NB * T, Cout, 2), jnp.float32)),
                grid=(NB, T),
                in_specs=[cols_spec, w_spec],
                out_specs=(map_spec, stat_spec),
                compiler_params=cparams,
            )(cols, w_mat)

        # Tiny O(Cout) epilogue: fold batch stats + gamma/beta into scale/shift.
        count = jnp.float32(N * HW)
        tot = jnp.sum(stats, axis=0)                   # (Cout, 2)
        mean = tot[:, 0:1] / count
        var = jnp.maximum(tot[:, 1:2] / count - mean * mean, 0.0)
        inv = lax.rsqrt(var + BN_EPS)
        scale = gamma.astype(jnp.float32).reshape(Cout, 1) * inv
        shift = beta.astype(jnp.float32).reshape(Cout, 1) - mean * scale
        # conv bias intentionally skipped: exactly cancelled by mean subtraction.

        if recompute:
            out = pl.pallas_call(
                _conv_bn_leaky_kernel,
                out_shape=jax.ShapeDtypeStruct((NB, Cout, Sp), jnp.float32),
                grid=(NB, T),
                in_specs=[cols_spec, w_spec, chan_spec, chan_spec],
                out_specs=map_spec,
                compiler_params=cparams,
            )(cols, w_mat, scale, shift)
        else:
            out = pl.pallas_call(
                _bn_leaky_kernel,
                out_shape=jax.ShapeDtypeStruct((NB, Cout, Sp), jnp.float32),
                grid=(NB, T),
                in_specs=[map_spec, chan_spec, chan_spec],
                out_specs=map_spec,
                compiler_params=cparams,
            )(conv_buf, scale, shift)
    else:
        out = pl.pallas_call(
            _conv_bias_leaky_kernel,
            out_shape=jax.ShapeDtypeStruct((NB, Cout, Sp), jnp.float32),
            grid=(NB, T),
            in_specs=[cols_spec, w_spec, chan_spec],
            out_specs=map_spec,
            compiler_params=cparams,
        )(cols, w_mat, b.astype(jnp.float32).reshape(Cout, 1))

    out = out[:, :, :S]
    if fold_batch:
        return out[0].reshape(Cout, N, Ho, Wo).transpose(1, 0, 2, 3)
    return out.reshape(N, Cout, Ho, Wo)


# ---------------------------------------------------------------------------
# Pure-JAX (XLA) reference, same math as the PyTorch module's forward
# ---------------------------------------------------------------------------
def _reference(x, w, b, gamma, beta, *, bn=True):
    conv = lax.conv_general_dilated(
        x.astype(jnp.float32), w.astype(jnp.float32),
        window_strides=(2, 2), padding=((1, 1), (1, 1)),
        dimension_numbers=("NCHW", "OIHW", "NCHW"))
    conv = conv + b.reshape(1, -1, 1, 1)
    if bn:
        mean = jnp.mean(conv, axis=(0, 2, 3), keepdims=True)
        var = jnp.mean((conv - mean) ** 2, axis=(0, 2, 3), keepdims=True)
        y = (conv - mean) * lax.rsqrt(var + BN_EPS)
        y = y * gamma.reshape(1, -1, 1, 1) + beta.reshape(1, -1, 1, 1)
    else:
        y = conv
    return jnp.where(y > 0, y, LEAKY_SLOPE * y)


if __name__ == "__main__":
    key = jax.random.PRNGKey(0)

    def make_inputs(n, cin, h, w, cout, k):
        k1, k2, k3, k4, k5 = jax.random.split(k, 5)
        x = jax.random.normal(k1, (n, cin, h, w), jnp.float32)
        wt = 0.1 * jax.random.normal(k2, (cout, cin, 3, 3), jnp.float32)
        bb = 0.1 * jax.random.normal(k3, (cout,), jnp.float32)
        g = 1.0 + 0.1 * jax.random.normal(k4, (cout,), jnp.float32)
        be = 0.1 * jax.random.normal(k5, (cout,), jnp.float32)
        return x, wt, bb, g, be

    # Covers: batch-folded / per-image layouts, materialized / recomputed conv,
    # T == 1 / T > 1 tiling, padded / unpadded spatial tiles, bn True / False.
    cases = [
        ((2, 4, 16, 16, 8), True, None),    # fold-batch, materialize, T=1
        ((2, 4, 10, 10, 8), True, None),    # fold-batch, materialize, padded
        ((2, 4, 10, 10, 8), False, None),   # fold-batch, bn=False, padded
        ((2, 3, 34, 34, 16), True, 128),    # per-image, recompute, T=3, padded
    ]
    keys = jax.random.split(key, len(cases))
    for (shp, bn, ov), kk in zip(cases, keys):
        x, wt, bb, g, be = make_inputs(*shp, kk)
        out = jax.block_until_ready(
            encoder_block(x, wt, bb, g, be, bn=bn, max_tile_override=ov))
        ref = _reference(x, wt, bb, g, be, bn=bn)
        assert out.shape == ref.shape, (out.shape, ref.shape)
        err = float(jnp.max(jnp.abs(out - ref)))
        assert jnp.allclose(out, ref, atol=2e-2, rtol=2e-2), (shp, bn, err)

    print("KERNEL_OK")
</pallas_src>

<mosaic_0001>
module attributes {stable_mosaic.version = 11 : i64} {
  func.func @_conv_stats_kernel(%arg0: i32, %arg1: i32, %arg2: memref<1x36x128xbf16, #tpu.memory_space<vmem>>, %arg3: memref<8x36xbf16, #tpu.memory_space<vmem>>, %arg4: memref<1x8x128xbf16, #tpu.memory_space<vmem>>, %arg5: memref<1x8x2xf32, #tpu.memory_space<vmem>>) attributes {dimension_semantics = [#tpu.dimension_semantics<parallel>, #tpu.dimension_semantics<parallel>], iteration_bounds = array<i64: 1, 1>, scalar_prefetch = 0 : i64, scratch_operands = 0 : i64, tpu.core_type = #tpu.core_type<tc>, window_params = [{transform_indices = @transform_0, window_bounds = array<i64: 1, 36, 128>}, {pipeline_mode = #tpu.pipeline_mode<synchronous>, transform_indices = @transform_1, window_bounds = array<i64: 8, 36>}, {transform_indices = @transform_2, window_bounds = array<i64: 1, 8, 128>}, {transform_indices = @transform_3, window_bounds = array<i64: 1, 8, 2>}]} {
    %c0 = arith.constant 0 : index
    %c0_0 = arith.constant 0 : index
    %0 = vector.load %arg3[%c0, %c0_0] : memref<8x36xbf16, #tpu.memory_space<vmem>>, vector<8x36xbf16>
    %c0_1 = arith.constant 0 : index
    %c0_2 = arith.constant 0 : index
    %c0_3 = arith.constant 0 : index
    %1 = vector.load %arg2[%c0_1, %c0_2, %c0_3] : memref<1x36x128xbf16, #tpu.memory_space<vmem>>, vector<1x36x128xbf16>
    %2 = vector.shape_cast %1 : vector<1x36x128xbf16> to vector<36x128xbf16>
    %cst = arith.constant dense<0.000000e+00> : vector<8x128xf32>
    %3 = tpu.matmul %0, %2, %cst {dimension_numbers = #tpu.dot_dimension_numbers<[1], [0], [0], [1], [0, 0, 1, 1], [], []>} : vector<8x36xbf16>, vector<36x128xbf16>, vector<8x128xf32> -> vector<8x128xf32>
    %4 = arith.truncf %3 : vector<8x128xf32> to vector<8x128xbf16>
    %c0_4 = arith.constant 0 : index
    %c0_5 = arith.constant 0 : index
    %c0_6 = arith.constant 0 : index
    %5 = vector.load %arg4[%c0_4, %c0_5, %c0_6] : memref<1x8x128xbf16, #tpu.memory_space<vmem>>, vector<1x8x128xbf16>
    %6 = vector.shape_cast %5 : vector<1x8x128xbf16> to vector<8x128xbf16>
    %7 = vector.shape_cast %4 : vector<8x128xbf16> to vector<1x8x128xbf16>
    tpu.vector_store %arg4[%c0_4, %c0_5, %c0_6], %7 {strides = array<i32>} : memref<1x8x128xbf16, #tpu.memory_space<vmem>>, vector<1x8x128xbf16>,
    %cst_7 = arith.constant dense<0.000000e+00> : vector<8xf32>
    %8 = vector.multi_reduction <add>, %3, %cst_7 [1] : vector<8x128xf32> to vector<8xf32>
    %9 = vector.shape_cast %8 : vector<8xf32> to vector<8x1xf32>
    %c0_8 = arith.constant 0 : index
    %c0_9 = arith.constant 0 : index
    %c0_10 = arith.constant 0 : index
    %10 = vector.load %arg5[%c0_8, %c0_9, %c0_10] : memref<1x8x2xf32, #tpu.memory_space<vmem>>, vector<1x8x1xf32>
    %11 = vector.shape_cast %10 : vector<1x8x1xf32> to vector<8x1xf32>
    %12 = vector.shape_cast %9 : vector<8x1xf32> to vector<1x8x1xf32>
    tpu.vector_store %arg5[%c0_8, %c0_9, %c0_10], %12 {strides = array<i32>} : memref<1x8x2xf32, #tpu.memory_space<vmem>>, vector<1x8x1xf32>,
    %13 = arith.mulf %3, %3 : vector<8x128xf32>
    %cst_11 = arith.constant dense<0.000000e+00> : vector<8xf32>
    %14 = vector.multi_reduction <add>, %13, %cst_11 [1] : vector<8x128xf32> to vector<8xf32>
    %15 = vector.shape_cast %14 : vector<8xf32> to vector<8x1xf32>
    %c0_12 = arith.constant 0 : index
    %c0_13 = arith.constant 0 : index
    %c1 = arith.constant 1 : index
    %16 = vector.load %arg5[%c0_12, %c0_13, %c1] : memref<1x8x2xf32, #tpu.memory_space<vmem>>, vector<1x8x1xf32>
    %17 = vector.shape_cast %16 : vector<1x8x1xf32> to vector<8x1xf32>
    %18 = vector.shape_cast %15 : vector<8x1xf32> to vector<1x8x1xf32>
    tpu.vector_store %arg5[%c0_12, %c0_13, %c1], %18 {strides = array<i32>} : memref<1x8x2xf32, #tpu.memory_space<vmem>>, vector<1x8x1xf32>,
    return
  }
  func.func @transform_0(%arg0: i32, %arg1: i32) -> (i32, i32, i32) {
    %c0_i32 = arith.constant 0 : i32
    %c0_i32_0 = arith.constant 0 : i32
    return %arg0, %c0_i32, %arg1 : i32, i32, i32
  }
  func.func @transform_1(%arg0: i32, %arg1: i32) -> (i32, i32) {
    %c0_i32 = arith.constant 0 : i32
    %c0_i32_0 = arith.constant 0 : i32
    %c0_i32_1 = arith.constant 0 : i32
    return %c0_i32, %c0_i32_0 : i32, i32
  }
  func.func @transform_2(%arg0: i32, %arg1: i32) -> (i32, i32, i32) {
    %c0_i32 = arith.constant 0 : i32
    %c0_i32_0 = arith.constant 0 : i32
    return %arg0, %c0_i32, %arg1 : i32, i32, i32
  }
  func.func @transform_3(%arg0: i32, %arg1: i32) -> (i32, i32, i32) {
    %c1_i32 = arith.constant 1 : i32
    %0 = arith.muli %arg0, %c1_i32 : i32
    %1 = arith.addi %0, %arg1 : i32
    %c0_i32 = arith.constant 0 : i32
    %c0_i32_0 = arith.constant 0 : i32
    %c0_i32_1 = arith.constant 0 : i32
    return %1, %c0_i32, %c0_i32_0 : i32, i32, i32
  }
}

module attributes {stable_mosaic.version = 11 : i64} {
  func.func @_bn_leaky_kernel(%arg0: i32, %arg1: i32, %arg2: memref<1x8x128xbf16, #tpu.memory_space<vmem>>, %arg3: memref<8x1xf32, #tpu.memory_space<vmem>>, %arg4: memref<8x1xf32, #tpu.memory_space<vmem>>, %arg5: memref<1x8x128xf32, #tpu.memory_space<vmem>>) attributes {dimension_semantics = [#tpu.dimension_semantics<parallel>, #tpu.dimension_semantics<parallel>], iteration_bounds = array<i64: 1, 1>, scalar_prefetch = 0 : i64, scratch_operands = 0 : i64, tpu.core_type = #tpu.core_type<tc>, window_params = [{transform_indices = @transform_0, window_bounds = array<i64: 1, 8, 128>}, {pipeline_mode = #tpu.pipeline_mode<synchronous>, transform_indices = @transform_1, window_bounds = array<i64: 8, 1>}, {pipeline_mode = #tpu.pipeline_mode<synchronous>, transform_indices = @transform_2, window_bounds = array<i64: 8, 1>}, {transform_indices = @transform_3, window_bounds = array<i64: 1, 8, 128>}]} {
    %c0 = arith.constant 0 : index
    %c0_0 = arith.constant 0 : index
    %c0_1 = arith.constant 0 : index
    %0 = vector.load %arg2[%c0, %c0_0, %c0_1] : memref<1x8x128xbf16, #tpu.memory_space<vmem>>, vector<1x8x128xbf16>
    %1 = vector.shape_cast %0 : vector<1x8x128xbf16> to vector<8x128xbf16>
    %2 = arith.extf %1 : vector<8x128xbf16> to vector<8x128xf32>
    %c0_2 = arith.constant 0 : index
    %c0_3 = arith.constant 0 : index
    %3 = vector.load %arg3[%c0_2, %c0_3] : memref<8x1xf32, #tpu.memory_space<vmem>>, vector<8x1xf32>
    %4 = vector.broadcast %3 : vector<8x1xf32> to vector<8x128xf32>
    %5 = arith.mulf %2, %4 : vector<8x128xf32>
    %c0_4 = arith.constant 0 : index
    %c0_5 = arith.constant 0 : index
    %6 = vector.load %arg4[%c0_4, %c0_5] : memref<8x1xf32, #tpu.memory_space<vmem>>, vector<8x1xf32>
    %7 = vector.broadcast %6 : vector<8x1xf32> to vector<8x128xf32>
    %8 = arith.addf %5, %7 : vector<8x128xf32>
    %cst = arith.constant 0.000000e+00 : f32
    %9 = vector.broadcast %cst : f32 to vector<8x128xf32>
    %10 = arith.cmpf ogt, %8, %9 : vector<8x128xf32>
    %cst_6 = arith.constant 2.000000e-01 : f32
    %11 = vector.broadcast %cst_6 : f32 to vector<8x128xf32>
    %12 = arith.mulf %11, %8 : vector<8x128xf32>
    %13 = arith.select %10, %8, %12 : vector<8x128xi1>, vector<8x128xf32>
    %c0_7 = arith.constant 0 : index
    %c0_8 = arith.constant 0 : index
    %c0_9 = arith.constant 0 : index
    %14 = vector.load %arg5[%c0_7, %c0_8, %c0_9] : memref<1x8x128xf32, #tpu.memory_space<vmem>>, vector<1x8x128xf32>
    %15 = vector.shape_cast %14 : vector<1x8x128xf32> to vector<8x128xf32>
    %16 = vector.shape_cast %13 : vector<8x128xf32> to vector<1x8x128xf32>
    tpu.vector_store %arg5[%c0_7, %c0_8, %c0_9], %16 {strides = array<i32>} : memref<1x8x128xf32, #tpu.memory_space<vmem>>, vector<1x8x128xf32>,
    return
  }
  func.func @transform_0(%arg0: i32, %arg1: i32) -> (i32, i32, i32) {
    %c0_i32 = arith.constant 0 : i32
    %c0_i32_0 = arith.constant 0 : i32
    return %arg0, %c0_i32, %arg1 : i32, i32, i32
  }
  func.func @transform_1(%arg0: i32, %arg1: i32) -> (i32, i32) {
    %c0_i32 = arith.constant 0 : i32
    %c0_i32_0 = arith.constant 0 : i32
    %c0_i32_1 = arith.constant 0 : i32
    return %c0_i32, %c0_i32_0 : i32, i32
  }
  func.func @transform_2(%arg0: i32, %arg1: i32) -> (i32, i32) {
    %c0_i32 = arith.constant 0 : i32
    %c0_i32_0 = arith.constant 0 : i32
    %c0_i32_1 = arith.constant 0 : i32
    return %c0_i32, %c0_i32_0 : i32, i32
  }
  func.func @transform_3(%arg0: i32, %arg1: i32) -> (i32, i32, i32) {
    %c0_i32 = arith.constant 0 : i32
    %c0_i32_0 = arith.constant 0 : i32
    return %arg0, %c0_i32, %arg1 : i32, i32, i32
  }
}

</mosaic_0001>

<bundles_post_ra>
// kernel: squeeze.1
= control target key start
LH: loop header
LB: loop body
LE: loop exit
PB: predicated region body
PF: predicated region fallthrough
CT: control target
= control target key end

     0   :  { %vm3_vm0 = vcmask 64512   ;;  %s264_s8 = smov 104   ;;  %s265_s17 = smov 112   ;;  %s547_s0 = inlined_call_operand.vmem [shape: f32[1,8,128], index: 0, kind: input, shape index: {}]   ;;  %s548_s1 = inlined_call_operand.vmem [shape: f32[8,2,8,8], index: 1, kind: output, shape index: {}]  }
   0x1   :  { %v8_v0 = vld [vmem:[%s547_s0] sm:$0xff]   ;;  %s263_s0 = smov 120   ;;  %s266_s18 = smov 96  }
   0x2   :  { %9 = vrot.lane.b32.xlu0 %v8_v0, %s263_s0  ;;  %33 = vrot.lane.b32.xlu1 %v8_v0, %s264_s8  ;;  %4 = vst.msk [vmem:[%s548_s1] ss:$16 sm:$0x3] %vm3_vm0, %v8_v0   ;;  %5 = vst.msk [vmem:[%s548_s1] ss:$16 sm:$0xc] %vm3_vm0, %v8_v0  }
   0x3   :  { %6 = vst.msk [vmem:[%s548_s1] ss:$16 sm:$0x30] %vm3_vm0, %v8_v0   ;;  %7 = vst.msk [vmem:[%s548_s1] ss:$16 sm:$0xc0] %vm3_vm0, %v8_v0  }
   0x4   :  { %s267_s19 = smov 88   ;;  %s268_s20 = smov 80  }
   0x5   :  { %s269_s21 = smov 72   ;;  %s270_s22 = smov 64  }
   0x6   :  { %21 = vrot.lane.b32.xlu0 %v8_v0, %s265_s17  ;;  %45 = vrot.lane.b32.xlu1 %v8_v0, %s266_s18  ;;  %s271_s23 = smov 56   ;;  %s272_s24 = smov 48  }
   0x7   :  { %s273_s25 = smov 40   ;;  %s274_s26 = smov 32  }
   0x8   :  { %s275_s27 = smov 24   ;;  %s276_s28 = smov 16  }
   0x9   :  { %s277_s29 = smov 8  }
   0xa   :  { %57 = vrot.lane.b32.xlu0 %v8_v0, %s267_s19  ;;  %69 = vrot.lane.b32.xlu1 %v8_v0, %s268_s20 }
   0xe   :  { %81 = vrot.lane.b32.xlu0 %v8_v0, %s269_s21  ;;  %93 = vrot.lane.b32.xlu1 %v8_v0, %s270_s22 }
  0x12   :  { %105 = vrot.lane.b32.xlu0 %v8_v0, %s271_s23  ;;  %117 = vrot.lane.b32.xlu1 %v8_v0, %s272_s24 }
  0x16   :  { %129 = vrot.lane.b32.xlu0 %v8_v0, %s273_s25  ;;  %141 = vrot.lane.b32.xlu1 %v8_v0, %s274_s26 }
  0x1a   :  { %153 = vrot.lane.b32.xlu0 %v8_v0, %s275_s27  ;;  %165 = vrot.lane.b32.xlu1 %v8_v0, %s276_s28 }
  0x1e   :  { %177 = vrot.lane.b32.xlu0 %v8_v0, %s277_s29 }
  0x74   :  { %v10_v1 = vpop.permute.xlu0 %9   ;;  %v34_v2 = vpop.permute.xlu1 %33  }
  0x75   :  { %188 = vst.msk [vmem:[%s548_s1 + $0x1] ss:$16 sm:$0x3] %vm3_vm0, %v10_v1   ;;  %189 = vst.msk [vmem:[%s548_s1 + $0x1] ss:$16 sm:$0xc] %vm3_vm0, %v10_v1  }
  0x76   :  { %190 = vst.msk [vmem:[%s548_s1 + $0x1] ss:$16 sm:$0x30] %vm3_vm0, %v10_v1   ;;  %191 = vst.msk [vmem:[%s548_s1 + $0x1] ss:$16 sm:$0xc0] %vm3_vm0, %v10_v1  }
  0x77   :  { %196 = vst.msk [vmem:[%s548_s1 + $0x3] ss:$16 sm:$0x3] %vm3_vm0, %v34_v2   ;;  %197 = vst.msk [vmem:[%s548_s1 + $0x3] ss:$16 sm:$0xc] %vm3_vm0, %v34_v2  }
  0x78   :  { %198 = vst.msk [vmem:[%s548_s1 + $0x3] ss:$16 sm:$0x30] %vm3_vm0, %v34_v2   ;;  %199 = vst.msk [vmem:[%s548_s1 + $0x3] ss:$16 sm:$0xc0] %vm3_vm0, %v34_v2   ;;  %v22_v3 = vpop.permute.xlu0 %21   ;;  %v46_v4 = vpop.permute.xlu1 %45  }
  0x79   :  { %192 = vst.msk [vmem:[%s548_s1 + $0x2] ss:$16 sm:$0x3] %vm3_vm0, %v22_v3   ;;  %193 = vst.msk [vmem:[%s548_s1 + $0x2] ss:$16 sm:$0xc] %vm3_vm0, %v22_v3  }
  0x7a   :  { %194 = vst.msk [vmem:[%s548_s1 + $0x2] ss:$16 sm:$0x30] %vm3_vm0, %v22_v3   ;;  %195 = vst.msk [vmem:[%s548_s1 + $0x2] ss:$16 sm:$0xc0] %vm3_vm0, %v22_v3  }
  0x7b   :  { %200 = vst.msk [vmem:[%s548_s1 + $0x4] ss:$16 sm:$0x3] %vm3_vm0, %v46_v4   ;;  %201 = vst.msk [vmem:[%s548_s1 + $0x4] ss:$16 sm:$0xc] %vm3_vm0, %v46_v4  }
  0x7c   :  { %202 = vst.msk [vmem:[%s548_s1 + $0x4] ss:$16 sm:$0x30] %vm3_vm0, %v46_v4   ;;  %203 = vst.msk [vmem:[%s548_s1 + $0x4] ss:$16 sm:$0xc0] %vm3_vm0, %v46_v4   ;;  %v58_v5 = vpop.permute.xlu0 %57   ;;  %v70_v6 = vpop.permute.xlu1 %69  }
  0x7d   :  { %204 = vst.msk [vmem:[%s548_s1 + $0x5] ss:$16 sm:$0x3] %vm3_vm0, %v58_v5   ;;  %205 = vst.msk [vmem:[%s548_s1 + $0x5] ss:$16 sm:$0xc] %vm3_vm0, %v58_v5  }
  0x7e   :  { %206 = vst.msk [vmem:[%s548_s1 + $0x5] ss:$16 sm:$0x30] %vm3_vm0, %v58_v5   ;;  %207 = vst.msk [vmem:[%s548_s1 + $0x5] ss:$16 sm:$0xc0] %vm3_vm0, %v58_v5  }
  0x7f   :  { %208 = vst.msk [vmem:[%s548_s1 + $0x6] ss:$16 sm:$0x3] %vm3_vm0, %v70_v6   ;;  %209 = vst.msk [vmem:[%s548_s1 + $0x6] ss:$16 sm:$0xc] %vm3_vm0, %v70_v6  }
  0x80   :  { %210 = vst.msk [vmem:[%s548_s1 + $0x6] ss:$16 sm:$0x30] %vm3_vm0, %v70_v6   ;;  %211 = vst.msk [vmem:[%s548_s1 + $0x6] ss:$16 sm:$0xc0] %vm3_vm0, %v70_v6   ;;  %v82_v7 = vpop.permute.xlu0 %81   ;;  %v94_v8 = vpop.permute.xlu1 %93  }
  0x81   :  { %212 = vst.msk [vmem:[%s548_s1 + $0x7] ss:$16 sm:$0x3] %vm3_vm0, %v82_v7   ;;  %213 = vst.msk [vmem:[%s548_s1 + $0x7] ss:$16 sm:$0xc] %vm3_vm0, %v82_v7  }
  0x82   :  { %214 = vst.msk [vmem:[%s548_s1 + $0x7] ss:$16 sm:$0x30] %vm3_vm0, %v82_v7   ;;  %215 = vst.msk [vmem:[%s548_s1 + $0x7] ss:$16 sm:$0xc0] %vm3_vm0, %v82_v7  }
  0x83   :  { %216 = vst.msk [vmem:[%s548_s1 + $0x8] ss:$16 sm:$0x3] %vm3_vm0, %v94_v8   ;;  %217 = vst.msk [vmem:[%s548_s1 + $0x8] ss:$16 sm:$0xc] %vm3_vm0, %v94_v8  }
  0x84   :  { %218 = vst.msk [vmem:[%s548_s1 + $0x8] ss:$16 sm:$0x30] %vm3_vm0, %v94_v8   ;;  %219 = vst.msk [vmem:[%s548_s1 + $0x8] ss:$16 sm:$0xc0] %vm3_vm0, %v94_v8   ;;  %v106_v9 = vpop.permute.xlu0 %105   ;;  %v118_v10 = vpop.permute.xlu1 %117  }
  0x85   :  { %220 = vst.msk [vmem:[%s548_s1 + $0x9] ss:$16 sm:$0x3] %vm3_vm0, %v106_v9   ;;  %221 = vst.msk [vmem:[%s548_s1 + $0x9] ss:$16 sm:$0xc] %vm3_vm0, %v106_v9  }
  0x86   :  { %222 = vst.msk [vmem:[%s548_s1 + $0x9] ss:$16 sm:$0x30] %vm3_vm0, %v106_v9   ;;  %223 = vst.msk [vmem:[%s548_s1 + $0x9] ss:$16 sm:$0xc0] %vm3_vm0, %v106_v9  }
  0x87   :  { %224 = vst.msk [vmem:[%s548_s1 + $0xa] ss:$16 sm:$0x3] %vm3_vm0, %v118_v10   ;;  %225 = vst.msk [vmem:[%s548_s1 + $0xa] ss:$16 sm:$0xc] %vm3_vm0, %v118_v10  }
  0x88   :  { %226 = vst.msk [vmem:[%s548_s1 + $0xa] ss:$16 sm:$0x30] %vm3_vm0, %v118_v10   ;;  %227 = vst.msk [vmem:[%s548_s1 + $0xa] ss:$16 sm:$0xc0] %vm3_vm0, %v118_v10   ;;  %v130_v11 = vpop.permute.xlu0 %129   ;;  %v142_v12 = vpop.permute.xlu1 %141  }
  0x89   :  { %228 = vst.msk [vmem:[%s548_s1 + $0xb] ss:$16 sm:$0x3] %vm3_vm0, %v130_v11   ;;  %229 = vst.msk [vmem:[%s548_s1 + $0xb] ss:$16 sm:$0xc] %vm3_vm0, %v130_v11  }
  0x8a   :  { %230 = vst.msk [vmem:[%s548_s1 + $0xb] ss:$16 sm:$0x30] %vm3_vm0, %v130_v11   ;;  %231 = vst.msk [vmem:[%s548_s1 + $0xb] ss:$16 sm:$0xc0] %vm3_vm0, %v130_v11  }
  0x8b   :  { %232 = vst.msk [vmem:[%s548_s1 + $0xc] ss:$16 sm:$0x3] %vm3_vm0, %v142_v12   ;;  %233 = vst.msk [vmem:[%s548_s1 + $0xc] ss:$16 sm:$0xc] %vm3_vm0, %v142_v12  }
  0x8c   :  { %234 = vst.msk [vmem:[%s548_s1 + $0xc] ss:$16 sm:$0x30] %vm3_vm0, %v142_v12   ;;  %235 = vst.msk [vmem:[%s548_s1 + $0xc] ss:$16 sm:$0xc0] %vm3_vm0, %v142_v12   ;;  %v154_v13 = vpop.permute.xlu0 %153   ;;  %v166_v14 = vpop.permute.xlu1 %165  }
  0x8d   :  { %236 = vst.msk [vmem:[%s548_s1 + $0xd] ss:$16 sm:$0x3] %vm3_vm0, %v154_v13   ;;  %237 = vst.msk [vmem:[%s548_s1 + $0xd] ss:$16 sm:$0xc] %vm3_vm0, %v154_v13  }
  0x8e   :  { %238 = vst.msk [vmem:[%s548_s1 + $0xd] ss:$16 sm:$0x30] %vm3_vm0, %v154_v13   ;;  %239 = vst.msk [vmem:[%s548_s1 + $0xd] ss:$16 sm:$0xc0] %vm3_vm0, %v154_v13  }
  0x8f   :  { %240 = vst.msk [vmem:[%s548_s1 + $0xe] ss:$16 sm:$0x3] %vm3_vm0, %v166_v14   ;;  %241 = vst.msk [vmem:[%s548_s1 + $0xe] ss:$16 sm:$0xc] %vm3_vm0, %v166_v14  }
  0x90   :  { %242 = vst.msk [vmem:[%s548_s1 + $0xe] ss:$16 sm:$0x30] %vm3_vm0, %v166_v14   ;;  %243 = vst.msk [vmem:[%s548_s1 + $0xe] ss:$16 sm:$0xc0] %vm3_vm0, %v166_v14   ;;  %v178_v15 = vpop.permute.xlu0 %177  }
  0x91   :  { %244 = vst.msk [vmem:[%s548_s1 + $0xf] ss:$16 sm:$0x3] %vm3_vm0, %v178_v15   ;;  %245 = vst.msk [vmem:[%s548_s1 + $0xf] ss:$16 sm:$0xc] %vm3_vm0, %v178_v15  }
  0x92   :  { %246 = vst.msk [vmem:[%s548_s1 + $0xf] ss:$16 sm:$0x30] %vm3_vm0, %v178_v15   ;;  %247 = vst.msk [vmem:[%s548_s1 + $0xf] ss:$16 sm:$0xc0] %vm3_vm0, %v178_v15  }

// kernel: encoder_block.3
= control target key start
LH: loop header
LB: loop body
LE: loop exit
PB: predicated region body
PF: predicated region fallthrough
CT: control target
= control target key end

     0   :  { %v40_v0 = vmov 0   ;;  %s73_s1 = inlined_call_operand.vmem [shape: f32[8,1], index: 1, kind: input, shape index: {}]   ;;  %s74_s2 = inlined_call_operand.vmem [shape: f32[8,1], index: 2, kind: input, shape index: {}]   ;;  %s75_s0 = inlined_call_operand.vmem [shape: bf16[1,8,128], index: 0, kind: input, shape index: {}]   ;;  %s76_s3 = inlined_call_operand.vmem [shape: f32[1,8,128], index: 3, kind: output, shape index: {}]  }
   0x1   :  { %39 = vset.pattern.permute.xlu0 %v40_v0  ;;  %v16_v1 = vld [vmem:[%s73_s1] sm:$0xff] }
   0x2   :  { %19 = vperm.xlu0 %39, %v16_v1   ;;  %v23_v2 = vld [vmem:[%s74_s2] sm:$0xff] }
   0x3   :  { %v14_v3 = vld [vmem:[%s75_s0] sm:$0xf] }
   0x4   :  { %v15_v4 = vunpack.c.l.bf16 %v14_v3 }
   0x6   :  { %26 = vperm.xlu0 %39, %v23_v2  }
  0x81   :  { %v20_v5 = vpop.permute.xlu0 %19 }
  0x82   :  { %v22_v6 = vmul.f32 %v20_v5, %v15_v4 }
  0x85   :  { %v27_v7 = vpop.permute.xlu0 %26 }
  0x86   :  { %v29_v8 = vadd.f32 %v27_v7, %v22_v6 }
  0x88   :  { %vm30_vm0 = vcmp.gt.f32.partialorder %v29_v8, 0.0  ;;  %v31_v9 = vmul.f32 0.2, %v29_v8 }
  0x8a   :  { %v32_v10 = vsel %vm30_vm0, %v29_v8, %v31_v9 }
  0x8b   :  { %33 = vst [vmem:[%s76_s3] sm:$0xff] %v32_v10 }

// kernel: encoder_block.2
= control target key start
LH: loop header
LB: loop body
LE: loop exit
PB: predicated region body
PF: predicated region fallthrough
CT: control target
= control target key end

     0   :  { %v155_v0 = vmov 0.0   ;;  %vm156_vm0 = vmmov 0   ;;  %vm50_vm1 = vcmask 1041408   ;;  %vm46_vm2 = vcmask 293888   ;;  %s198_s0 = inlined_call_operand.vmem [shape: bf16[1,36,128], index: 0, kind: input, shape index: {}]   ;;  %s199_s1 = inlined_call_operand.vmem [shape: bf16[8,36], index: 1, kind: input, shape index: {}]   ;;  %s200_s2 = inlined_call_operand.vmem [shape: bf16[1,8,128], index: 2, kind: output, shape index: {0}]   ;;  %s201_s3 = inlined_call_operand.vmem [shape: f32[1,8,2], index: 3, kind: output, shape index: {1}]  }
   0x1   :  { %140 = vmatprep.subr.bf16.mxu0 %v155_v0  ;;  %v152_v1 = vld [vmem:[%s198_s0] sm:$0xff]   ;;  %146 = vmatprep.mubr.msk.bf16.mxu0 %vm156_vm0, %v155_v0  ;;  %v153_v2 = vld [vmem:[%s198_s0 + $0x8] sm:$0xff]   ;;  %v154_v3 = vld [vmem:[%s198_s0 + $0x10] ss:$0 sps:$4 sm:$0x33]   ;;  %vm98_vm3 = vcmask 7168  }
   0x2   :  { %141 = vmatpush3.bf16.msra.mxu0 %v152_v1  ;;  %v52_v4 = vsel %vm50_vm1, %v154_v3, 0  ;;  %v25_v5 = vld [vmem:[%s199_s1] sm:$0xf]  ;;  %vm103_vm4 = vcmask 15368  }
   0x3   :  { %142 = vmatprep.subr.bf16.mxu0 %v155_v0 }
   0x6   :  { %143 = vmatpush3.bf16.msra.mxu0 %v153_v2 }
   0x7   :  { %144 = vmatprep.subr.bf16.mxu0 %v155_v0 }
   0xa   :  { %145 = vmatpush3.bf16.msra.mxu0 %v52_v4 }
   0xd   :  { %147 = vmatmul.mubr.msk.bf16.vlgmr.msra.gmra.mrb[0].mxu0 %vm46_vm2, %v25_v5 }
  0xe0   :  { %v88_v6 = vpop.f32.mrb[0].mxu0 }
  0xe1   :  { %v94_v7 = vpack.c.bf16 %v88_v6, %v88_v6  ;;  %96 = vadd.xlane.f32.xlu0 %v88_v6  ;;  %v148_v8 = vpop.f32.mrb[1].mxu0  ;;  %v100_v11 = vmul.f32 %v88_v6, %v88_v6 }
  0xe2   :  { %v91_v9 = vpop.f32.mrb[2].mxu0 }
  0xe3   :  { %95 = vst [vmem:[%s200_s2] sm:$0xf] %v94_v7  ;;  %v149_v10 = vpop.f32.mrb[3].mxu0 }
  0xe5   :  { %101 = vadd.xlane.f32.xlu0 %v100_v11 }
 0x16e   :  { %v97_v12 = vpop.xlane.xlu0 %96 }
 0x16f   :  { %99 = vst.msk [vmem:[%s201_s3] sm:$0xff] %vm98_vm3, %v97_v12 }
 0x172   :  { %v102_v13 = vpop.xlane.xlu0 %101 }
 0x173   :  { %104 = vst.msk [vmem:[%s201_s3] sm:$0xff] %vm103_vm4, %v102_v13 }

</bundles_post_ra>
